<compile_context>
chip_gen: v6e
topology: v6e:2x2x1
jax: 0.10.0
libtpu: 0.0.40
codegen_flags: <defaults>
</compile_context>

<pallas_src>
import functools

import jax
import jax.numpy as jnp
from jax.experimental import pallas as pl
from jax.experimental.pallas import tpu as pltpu


_MIN_SPLIT_BYTES = 512 * 1024   # above this, force >= 2 grid steps (pipelining / 2 TCs)


def _round_up(x, m):
    return (x + m - 1) // m * m


def _round_down(x, m):
    return max(m, (x // m) * m)


@functools.lru_cache(maxsize=None)
def _budgets():
    """(tile_target_bytes, vmem_limit_bytes), generation-aware."""
    vmem = None
    try:
        info = pltpu.get_tpu_info()
        for attr in ("vmem_capacity_bytes", "vmem_size_bytes", "vmem_bytes"):
            v = getattr(info, attr, None)
            if v:
                vmem = int(v)
                break
    except Exception:
        vmem = None
    if vmem is None:
        vmem = 64 * 1024 * 1024                     # conservative: v7x per-TC
    if vmem >= 100 * 1024 * 1024:                   # v5e / v6e: 128 MiB physical VMEM
        return 4 * 1024 * 1024, 64 * 1024 * 1024
    return 2 * 1024 * 1024, 40 * 1024 * 1024        # v7x: 64 MiB per TensorCore


def _pick_block(dim, target, align, force_split):
    """Block size along one dim: a multiple of `align` (or the full dim when the
    dim is tiny), roughly `target` elements, and -- when `force_split` -- small
    enough that there are at least two (preferably an even number of) grid
    steps, so the grid shards across v7x's two TensorCores and the Pallas
    pipeline gets prefetch/writeback overlap."""
    if dim <= align:
        return dim
    if target >= dim and not force_split:
        return dim
    target = max(align, min(target, dim))
    n_blk = pl.cdiv(dim, _round_down(target, align))
    if force_split and n_blk < 2:
        n_blk = 2
    if n_blk >= 2 and n_blk % 2 == 1 and n_blk < 16:
        n_blk += 1                                  # even block count -> balanced 2-TC split
    if n_blk <= 1:
        return dim
    return min(dim, max(align, _round_up(pl.cdiv(dim, n_blk), align)))


# ----------------------------------------------------------------------------
# channels_last kernels: normalize length-c segments of lane-dense rows
# ----------------------------------------------------------------------------
def _make_seg_matrix(k, c):
    """(k*c, k*c) bf16 block-diagonal matrix with 1/c on the diagonal blocks.
    c is a power of two here, so 1/c is exact in bf16 (no VPU rescale needed)."""
    kc = k * c
    row = jnp.arange(kc, dtype=jnp.int32)[:, None] // c
    col = jnp.arange(kc, dtype=jnp.int32)[None, :] // c
    return jnp.where(row == col, jnp.bfloat16(1.0 / c), jnp.bfloat16(0.0))


def _segment_means(v, seg):
    """Per-segment means of f32 `v`, broadcast back to every lane of the
    segment, computed on the otherwise-idle MXU.  bf16 hi/lo split keeps the
    result accurate to ~f32 (far below LayerNorm tolerances)."""
    v_hi = v.astype(jnp.bfloat16)
    v_lo = (v - v_hi.astype(jnp.float32)).astype(jnp.bfloat16)
    return (jnp.dot(v_hi, seg, preferred_element_type=jnp.float32)
            + jnp.dot(v_lo, seg, preferred_element_type=jnp.float32))


def _ln_packed_kernel(x_ref, w_ref, b_ref, seg_ref, o_ref, *, eps):
    """k logical rows packed per lane row: segmented stats via block-diag matmul."""
    x = x_ref[...].astype(jnp.float32)                 # (bm, k*c), lane-dense
    seg = seg_ref[...]                                 # (k*c, k*c) bf16, 1/c blocks
    mean = _segment_means(x, seg)
    xc = x - mean
    var = _segment_means(xc * xc, seg)                 # biased variance (matches torch)
    inv = jax.lax.rsqrt(var + eps)
    w = w_ref[...].astype(jnp.float32)                 # (1, k*c), broadcasts
    b = b_ref[...].astype(jnp.float32)
    o_ref[...] = (xc * inv * w + b).astype(o_ref.dtype)


def _ln_rowwise_kernel(x_ref, w_ref, b_ref, o_ref, *, eps):
    """Plain per-row LayerNorm over the last (lane) dim; exact f32."""
    x = x_ref[...].astype(jnp.float32)                 # (bm, c)
    mean = jnp.mean(x, axis=-1, keepdims=True)
    xc = x - mean
    var = jnp.mean(xc * xc, axis=-1, keepdims=True)    # biased variance
    inv = jax.lax.rsqrt(var + eps)
    w = w_ref[...].astype(jnp.float32)
    b = b_ref[...].astype(jnp.float32)
    o_ref[...] = (xc * inv * w + b).astype(o_ref.dtype)


def _layernorm_lastdim(x2d, weight, bias, eps):
    """LayerNorm over the last dim of a (N, C) array via a Pallas kernel."""
    n, c = x2d.shape
    tile_target, vmem_limit = _budgets()

    # Lane packing: fold k rows into one lane-dense row of width k*c.
    # 128 % c == 0  =>  c and 128//c are powers of two, so when n isn't
    # divisible by 128//c we drop to the largest power-of-two k dividing n
    # (partial lane density is still far better than width=c).
    k = 1
    if c < 128 and 128 % c == 0:
        k = 128 // c
        while k > 1 and n % k != 0:
            k //= 2
    # TODO(synk): full-density main/remainder split for n % (128//c) != 0.

    width = k * c
    rows = n // k
    xp = x2d.reshape(rows, width)                      # free row-major reshape
    w = jnp.tile(weight.astype(jnp.float32), k).reshape(1, width)
    b = jnp.tile(bias.astype(jnp.float32), k).reshape(1, width)

    itemsize = jnp.dtype(x2d.dtype).itemsize
    sub_align = max(8, 32 // itemsize)                 # 8 f32 / 16 bf16 / 32 int8
    row_bytes = _round_up(width, 128) * itemsize       # VMEM lane padding counted
    bm_target = max(sub_align, tile_target // row_bytes)
    force_split = rows * row_bytes > _MIN_SPLIT_BYTES
    bm = _pick_block(rows, bm_target, sub_align, force_split)
    grid = pl.cdiv(rows, bm)                           # partial last block is masked

    if k > 1:
        kernel = functools.partial(_ln_packed_kernel, eps=eps)
        extra_inputs = (_make_seg_matrix(k, c),)       # ~32 KiB resident constant
        extra_specs = [pl.BlockSpec((width, width), lambda i: (0, 0))]
    else:
        kernel = functools.partial(_ln_rowwise_kernel, eps=eps)
        extra_inputs = ()
        extra_specs = []

    out = pl.pallas_call(
        kernel,
        out_shape=jax.ShapeDtypeStruct((rows, width), x2d.dtype),
        grid_spec=pl.GridSpec(
            grid=(grid,),
            in_specs=[
                pl.BlockSpec((bm, width), lambda i: (i, 0)),
                pl.BlockSpec((1, width), lambda i: (0, 0)),
                pl.BlockSpec((1, width), lambda i: (0, 0)),
            ] + extra_specs,
            out_specs=pl.BlockSpec((bm, width), lambda i: (i, 0)),
        ),
        compiler_params=pltpu.CompilerParams(
            dimension_semantics=("parallel",),
            vmem_limit_bytes=vmem_limit,
        ),
    )(xp, w, b, *extra_inputs)
    return out.reshape(n, c)


# ----------------------------------------------------------------------------
# channels_first kernel: native NCHW, reduce over C (sublane axis), HW on lanes
# ----------------------------------------------------------------------------
def _ln_chfirst_kernel(x_ref, w_ref, b_ref, o_ref, *, eps):
    x = x_ref[...].astype(jnp.float32)                 # (b_tile, C, t_hw)
    mean = jnp.mean(x, axis=1, keepdims=True)          # cheap sublane reduce
    xc = x - mean
    var = jnp.mean(xc * xc, axis=1, keepdims=True)     # biased variance
    inv = jax.lax.rsqrt(var + eps)
    w = w_ref[...].astype(jnp.float32)                 # (C, 1), broadcasts
    b = b_ref[...].astype(jnp.float32)
    o_ref[...] = (xc * inv * w + b).astype(o_ref.dtype)


def _layernorm_chfirst(x, weight, bias, eps):
    """channels_first LayerNorm on (B, C, H, W) without any transpose."""
    bsz, c, h, w = x.shape
    hw = h * w
    x3 = x.reshape(bsz, c, hw)                         # free row-major reshape
    wgt = weight.astype(jnp.float32).reshape(c, 1)
    bia = bias.astype(jnp.float32).reshape(c, 1)

    tile_target, vmem_limit = _budgets()
    itemsize = jnp.dtype(x.dtype).itemsize
    sub_align = max(8, 32 // itemsize)
    col_bytes = _round_up(c, sub_align) * itemsize     # VMEM bytes per lane column
    per_image_bytes = col_bytes * _round_up(hw, 128)
    total_bytes = bsz * per_image_bytes

    if per_image_bytes >= tile_target:
        # Large feature maps: one image per grid step, tile the H*W (lane) axis.
        b_tile = 1
        t_hw_target = max(128, tile_target // col_bytes)
        t_hw = _pick_block(hw, t_hw_target, 128, force_split=(bsz == 1))
    else:
        # Small feature maps: pack several images into one grid step so per-step
        # DMAs amortize the fixed grid-step overhead.
        t_hw = hw                                      # full-dim block (always legal)
        b_target = max(1, tile_target // per_image_bytes)
        b_tile = _pick_block(bsz, b_target, 1,
                             force_split=total_bytes > _MIN_SPLIT_BYTES)

    g_b = pl.cdiv(bsz, b_tile)
    g_hw = pl.cdiv(hw, t_hw)                           # partial blocks are masked

    out = pl.pallas_call(
        functools.partial(_ln_chfirst_kernel, eps=eps),
        out_shape=jax.ShapeDtypeStruct((bsz, c, hw), x.dtype),
        grid_spec=pl.GridSpec(
            grid=(g_b, g_hw),
            in_specs=[
                pl.BlockSpec((b_tile, c, t_hw), lambda i, j: (i, 0, j)),
                pl.BlockSpec((c, 1), lambda i, j: (0, 0)),
                pl.BlockSpec((c, 1), lambda i, j: (0, 0)),
            ],
            out_specs=pl.BlockSpec((b_tile, c, t_hw), lambda i, j: (i, 0, j)),
        ),
        compiler_params=pltpu.CompilerParams(
            dimension_semantics=("parallel", "parallel"),
            vmem_limit_bytes=vmem_limit,
        ),
    )(x3, wgt, bia)
    return out.reshape(bsz, c, h, w)


# ----------------------------------------------------------------------------
# Module mirror
# ----------------------------------------------------------------------------
class LayerNormPallas:
    """Mirror of the PyTorch LayerNorm module (channels_last / channels_first)."""

    def __init__(self, normalized_shape, eps=1e-6, data_format="channels_last",
                 weight=None, bias=None):
        if data_format not in ("channels_last", "channels_first"):
            raise NotImplementedError
        self.eps = eps
        self.data_format = data_format
        self.normalized_shape = (normalized_shape,)
        self.weight = (jnp.ones((normalized_shape,), jnp.float32)
                       if weight is None else weight)
        self.bias = (jnp.zeros((normalized_shape,), jnp.float32)
                     if bias is None else bias)

    def __call__(self, x):
        c = self.normalized_shape[0]
        if self.data_format == "channels_last":
            orig_shape = x.shape
            assert orig_shape[-1] == c
            y = _layernorm_lastdim(x.reshape(-1, c), self.weight, self.bias,
                                   self.eps)
            return y.reshape(orig_shape)
        else:
            assert x.ndim == 4 and x.shape[1] == c
            return _layernorm_chfirst(x, self.weight, self.bias, self.eps)


# ----------------------------------------------------------------------------
# References + smoke test
# ----------------------------------------------------------------------------
def _ref_channels_last(x, w, b, eps):
    mean = jnp.mean(x, axis=-1, keepdims=True)
    var = jnp.mean((x - mean) ** 2, axis=-1, keepdims=True)
    return (x - mean) / jnp.sqrt(var + eps) * w + b


def _ref_channels_first(x, w, b, eps):
    u = jnp.mean(x, axis=1, keepdims=True)
    s = jnp.mean((x - u) ** 2, axis=1, keepdims=True)
    xn = (x - u) / jnp.sqrt(s + eps)
    return w[None, :, None, None] * xn + b[None, :, None, None]


if __name__ == "__main__":
    key = jax.random.PRNGKey(0)
    k1, k2, k3, k4, k5, k6 = jax.random.split(key, 6)

    C = 32
    eps = 1e-6
    weight = 1.0 + 0.1 * jax.random.normal(k3, (C,), jnp.float32)
    bias = 0.1 * jax.random.normal(k4, (C,), jnp.float32)

    # bf16 hi/lo MXU segment sums are ~f32 but not bit-exact: keep a tolerance.
    tol = dict(atol=3e-5, rtol=3e-5)

    # channels_last: (B, H, W, C) — lane-packed path (k = 128 // 32 = 4).
    x_last = jax.random.normal(k1, (2, 8, 8, C), jnp.float32)
    ln_last = LayerNormPallas(C, eps=eps, data_format="channels_last",
                              weight=weight, bias=bias)
    y_last = jax.block_until_ready(ln_last(x_last))
    assert jnp.allclose(y_last, _ref_channels_last(x_last, weight, bias, eps), **tol)

    # channels_last with a row count not divisible by 4 (3*7*5 = 105):
    # exercises the reduced-k / row-wise fallback.
    x_odd = jax.random.normal(k5, (3, 7, 5, C), jnp.float32)
    y_odd = jax.block_until_ready(ln_last(x_odd))
    assert jnp.allclose(y_odd, _ref_channels_last(x_odd, weight, bias, eps), **tol)

    # channels_first: (B, C, H, W) — native NCHW kernel, batched small maps.
    x_first = jax.random.normal(k2, (2, C, 8, 8), jnp.float32)
    ln_first = LayerNormPallas(C, eps=eps, data_format="channels_first",
                               weight=weight, bias=bias)
    y_first = jax.block_until_ready(ln_first(x_first))
    assert jnp.allclose(y_first, _ref_channels_first(x_first, weight, bias, eps), **tol)

    # channels_first with H*W not a multiple of 128.
    x_first2 = jax.random.normal(k6, (2, C, 10, 20), jnp.float32)
    y_first2 = jax.block_until_ready(ln_first(x_first2))
    assert jnp.allclose(y_first2, _ref_channels_first(x_first2, weight, bias, eps), **tol)

    print("KERNEL_OK")
</pallas_src>

<mosaic_0001>
module attributes {stable_mosaic.version = 11 : i64} {
  func.func @_ln_packed_kernel(%arg0: i32, %arg1: memref<32x128xf32, #tpu.memory_space<vmem>>, %arg2: memref<1x128xf32, #tpu.memory_space<vmem>>, %arg3: memref<1x128xf32, #tpu.memory_space<vmem>>, %arg4: memref<128x128xbf16, #tpu.memory_space<vmem>>, %arg5: memref<32x128xf32, #tpu.memory_space<vmem>>) attributes {dimension_semantics = [#tpu.dimension_semantics<parallel>], iteration_bounds = array<i64: 1>, scalar_prefetch = 0 : i64, scratch_operands = 0 : i64, tpu.core_type = #tpu.core_type<tc>, window_params = [{transform_indices = @transform_0, window_bounds = array<i64: 32, 128>}, {pipeline_mode = #tpu.pipeline_mode<synchronous>, transform_indices = @transform_1, window_bounds = array<i64: 1, 128>}, {pipeline_mode = #tpu.pipeline_mode<synchronous>, transform_indices = @transform_2, window_bounds = array<i64: 1, 128>}, {pipeline_mode = #tpu.pipeline_mode<synchronous>, transform_indices = @transform_3, window_bounds = array<i64: 128, 128>}, {transform_indices = @transform_4, window_bounds = array<i64: 32, 128>}]} {
    %c0 = arith.constant 0 : index
    %c0_0 = arith.constant 0 : index
    %0 = vector.load %arg1[%c0, %c0_0] : memref<32x128xf32, #tpu.memory_space<vmem>>, vector<32x128xf32>
    %c0_1 = arith.constant 0 : index
    %c0_2 = arith.constant 0 : index
    %1 = vector.load %arg4[%c0_1, %c0_2] : memref<128x128xbf16, #tpu.memory_space<vmem>>, vector<128x128xbf16>
    %2 = arith.truncf %0 : vector<32x128xf32> to vector<32x128xbf16>
    %3 = arith.extf %2 : vector<32x128xbf16> to vector<32x128xf32>
    %4 = arith.subf %0, %3 : vector<32x128xf32>
    %5 = arith.truncf %4 : vector<32x128xf32> to vector<32x128xbf16>
    %cst = arith.constant dense<0.000000e+00> : vector<32x128xf32>
    %6 = tpu.matmul %2, %1, %cst {dimension_numbers = #tpu.dot_dimension_numbers<[1], [0], [0], [1], [0, 0, 1, 1], [], []>} : vector<32x128xbf16>, vector<128x128xbf16>, vector<32x128xf32> -> vector<32x128xf32>
    %cst_3 = arith.constant dense<0.000000e+00> : vector<32x128xf32>
    %7 = tpu.matmul %5, %1, %cst_3 {dimension_numbers = #tpu.dot_dimension_numbers<[1], [0], [0], [1], [0, 0, 1, 1], [], []>} : vector<32x128xbf16>, vector<128x128xbf16>, vector<32x128xf32> -> vector<32x128xf32>
    %8 = arith.addf %6, %7 : vector<32x128xf32>
    %9 = arith.subf %0, %8 : vector<32x128xf32>
    %10 = arith.mulf %9, %9 : vector<32x128xf32>
    %11 = arith.truncf %10 : vector<32x128xf32> to vector<32x128xbf16>
    %12 = arith.extf %11 : vector<32x128xbf16> to vector<32x128xf32>
    %13 = arith.subf %10, %12 : vector<32x128xf32>
    %14 = arith.truncf %13 : vector<32x128xf32> to vector<32x128xbf16>
    %cst_4 = arith.constant dense<0.000000e+00> : vector<32x128xf32>
    %15 = tpu.matmul %11, %1, %cst_4 {dimension_numbers = #tpu.dot_dimension_numbers<[1], [0], [0], [1], [0, 0, 1, 1], [], []>} : vector<32x128xbf16>, vector<128x128xbf16>, vector<32x128xf32> -> vector<32x128xf32>
    %cst_5 = arith.constant dense<0.000000e+00> : vector<32x128xf32>
    %16 = tpu.matmul %14, %1, %cst_5 {dimension_numbers = #tpu.dot_dimension_numbers<[1], [0], [0], [1], [0, 0, 1, 1], [], []>} : vector<32x128xbf16>, vector<128x128xbf16>, vector<32x128xf32> -> vector<32x128xf32>
    %17 = arith.addf %15, %16 : vector<32x128xf32>
    %cst_6 = arith.constant 9.99999997E-7 : f32
    %18 = vector.broadcast %cst_6 : f32 to vector<32x128xf32>
    %19 = arith.addf %17, %18 : vector<32x128xf32>
    %20 = math.rsqrt %19 : vector<32x128xf32>
    %c0_7 = arith.constant 0 : index
    %c0_8 = arith.constant 0 : index
    %21 = vector.load %arg2[%c0_7, %c0_8] : memref<1x128xf32, #tpu.memory_space<vmem>>, vector<1x128xf32>
    %c0_9 = arith.constant 0 : index
    %c0_10 = arith.constant 0 : index
    %22 = vector.load %arg3[%c0_9, %c0_10] : memref<1x128xf32, #tpu.memory_space<vmem>>, vector<1x128xf32>
    %23 = arith.mulf %9, %20 : vector<32x128xf32>
    %24 = vector.broadcast %21 : vector<1x128xf32> to vector<32x128xf32>
    %25 = arith.mulf %23, %24 : vector<32x128xf32>
    %26 = vector.broadcast %22 : vector<1x128xf32> to vector<32x128xf32>
    %27 = arith.addf %25, %26 : vector<32x128xf32>
    %c0_11 = arith.constant 0 : index
    %c0_12 = arith.constant 0 : index
    %28 = vector.load %arg5[%c0_11, %c0_12] : memref<32x128xf32, #tpu.memory_space<vmem>>, vector<32x128xf32>
    tpu.vector_store %arg5[%c0_11, %c0_12], %27 {strides = array<i32>} : memref<32x128xf32, #tpu.memory_space<vmem>>, vector<32x128xf32>,
    return
  }
  func.func @transform_0(%arg0: i32) -> (i32, i32) {
    %c0_i32 = arith.constant 0 : i32
    %c0_i32_0 = arith.constant 0 : i32
    return %arg0, %c0_i32 : i32, i32
  }
  func.func @transform_1(%arg0: i32) -> (i32, i32) {
    %c0_i32 = arith.constant 0 : i32
    %c0_i32_0 = arith.constant 0 : i32
    %c0_i32_1 = arith.constant 0 : i32
    return %c0_i32, %c0_i32_0 : i32, i32
  }
  func.func @transform_2(%arg0: i32) -> (i32, i32) {
    %c0_i32 = arith.constant 0 : i32
    %c0_i32_0 = arith.constant 0 : i32
    %c0_i32_1 = arith.constant 0 : i32
    return %c0_i32, %c0_i32_0 : i32, i32
  }
  func.func @transform_3(%arg0: i32) -> (i32, i32) {
    %c0_i32 = arith.constant 0 : i32
    %c0_i32_0 = arith.constant 0 : i32
    %c0_i32_1 = arith.constant 0 : i32
    return %c0_i32, %c0_i32_0 : i32, i32
  }
  func.func @transform_4(%arg0: i32) -> (i32, i32) {
    %c0_i32 = arith.constant 0 : i32
    %c0_i32_0 = arith.constant 0 : i32
    return %arg0, %c0_i32 : i32, i32
  }
}

</mosaic_0001>

<bundles_post_ra>
// kernel: tpu_custom_call.1
= control target key start
LH: loop header
LB: loop body
LE: loop exit
PB: predicated region body
PF: predicated region fallthrough
CT: control target
= control target key end

     0   :  { %9 = vsyncpa [#allocation3], 0  ;;  %s701_s0 = inlined_call_operand.hbm [shape: f32[32,128], index: 0, kind: input, shape index: {}]   ;;  %s702_s1 = inlined_call_operand.vmem [shape: f32[1,128], index: 1, kind: input, shape index: {}]   ;;  %s703_s2 = inlined_call_operand.vmem [shape: f32[1,128], index: 2, kind: input, shape index: {}]   ;;  %s704_s3 = inlined_call_operand.hbm [shape: bf16[128,128], index: 3, kind: input, shape index: {}]   ;;  %s705_s4 = inlined_call_operand.hbm [shape: f32[32,128], index: 4, kind: output, shape index: {}]  }
   0x1   :  { %10 = vsyncpa [#allocation6], 0 }
   0x2   :  { %11 = vsyncpa [#allocation4], 0  ;;  %s618_s15 = smov [#allocation2]  }
   0x3   :  { %s17_s16 = sshll.u32 %s618_s15, 4  ;;  %s18_s16 = int_to_ptr.vmem [resolvable:$true] %s17_s16 }
   0x4   :  { %s560_s17 = scalar_lea.vmem %s18_s16, 512  ;;  %p565_p1 = scmp.lt.s32.totalorder %s18_s16, %s18_s16 }
   0x5   :  { %p561_p0 = scmp.ne.s32.totalorder %s18_s16, %s560_s17  ;;  %p566_p2 = scmp.lt.s32.totalorder %s560_s17, %s560_s17 }
   0x7   :  { %p567_p3 = por %p566_p2, %p565_p1 }
   0x9   :  { %p568_p4 = pnand %p567_p3, %p561_p0 }
   0xb   :  { %571 = shalt.err (!%p568_p4)
}
   0xc   :  { %s619_s18 = smov 128   ;;  %s620_s19 = smov 8  }
   0xd   :  { %23 = dma.hbm_to_vmem [thread:$0]  %s701_s0, 512, %s18_s16, [#allocation3], %s619_s18, %s619_s18, %s620_s19  }
   0xe   :  { %s621_s22 = smov [#allocation5]  }
   0xf   :  { %s33_s23 = sshll.u32 %s621_s22, 4  ;;  %s34_s23 = int_to_ptr.vmem [resolvable:$true] %s33_s23 }
  0x10   :  { %s580_s24 = scalar_lea.vmem %s34_s23, 1024  ;;  %p585_p6 = scmp.lt.s32.totalorder %s34_s23, %s34_s23 }
  0x11   :  { %p581_p5 = scmp.ne.s32.totalorder %s34_s23, %s580_s24  ;;  %p586_p7 = scmp.lt.s32.totalorder %s580_s24, %s580_s24 }
  0x13   :  { %p587_p8 = por %p586_p7, %p585_p6 }
  0x15   :  { %p588_p9 = pnand %p587_p8, %p581_p5 }
  0x17   :  { %591 = shalt.err (!%p588_p9)
}
  0x18   :  { %s622_s25 = smov 64   ;;  %s623_s26 = smov 4  }
  0x19   :  { %39 = dma.hbm_to_vmem [thread:$0]  %s704_s3, 1024, %s34_s23, [#allocation6], %s622_s25, %s622_s25, %s623_s26  }
  0x1a   :  { %612 = dma.done.wait [#allocation3], 512  }
  0x1b   :  { %613 = vsyncadd [#allocation3], 4294966784 }
  0x1c   :  { %614 = dma.done.wait [#allocation6], 1024  }
  0x1d   :  { %615 = vsyncadd [#allocation6], 4294966272  ;;  %v536_v0 = vld [vmem:[#allocation5 + $0x38] sm:$0xff]   ;;  %v659_v1 = vld [vmem:[#allocation5 + $0x30] sm:$0xff]   ;;  %s624_s5 = smov [#allocation7]  }
  0x1e   :  { %449 = vmatprep.subr.bf16.mxu0 %v536_v0  ;;  %469 = vmatprep.subr.bf16.mxu1 %v536_v0  ;;  %v538_v2 = vld [vmem:[#allocation5 + $0x28] sm:$0xff]   ;;  %v539_v3 = vld [vmem:[#allocation5 + $0x20] sm:$0xff]   ;;  %v540_v9 = vld [vmem:[#allocation5 + $0x18] sm:$0xff]   ;;  %s386_s6 = sshll.u32 %s624_s5, 4  ;;  %s387_s6 = int_to_ptr.vmem [resolvable:$true] %s386_s6 }
  0x1f   :  { %450 = vmatpush3.bf16.msra.mxu0 %v536_v0  ;;  %470 = vmatpush3.bf16.msra.mxu1 %v536_v0  ;;  %v665_v4 = vld [vmem:[#allocation2] sm:$0xff]  ;;  %v667_v5 = vld [vmem:[#allocation2 + $0x8] sm:$0xff]  ;;  %v673_v13 = vld [vmem:[#allocation2 + $0x10] sm:$0xff]  ;;  %p597_p11 = scmp.lt.s32.totalorder %s387_s6, %s387_s6 }
  0x20   :  { %451 = vmatprep.subr.bf16.mxu0 %v659_v1  ;;  %471 = vmatprep.subr.bf16.mxu1 %v659_v1  ;;  %v67_v6 = vpack.c.bf16 %v667_v5, %v665_v4  ;;  %v675_v14 = vld [vmem:[#allocation2 + $0x18] sm:$0xff]  ;;  %v541_v15 = vld [vmem:[#allocation5 + $0x10] sm:$0xff]   ;;  %v542_v17 = vld [vmem:[#allocation5 + $0x8] sm:$0xff]  }
  0x21   :  { %v68_v16 = vpack.c.bf16 %v675_v14, %v673_v13  ;;  %v543_v20 = vld [vmem:[#allocation5] sm:$0xff]  }
  0x22   :  { %v69_v7 = vunpack.c.l.bf16 %v67_v6  ;;  %v70_v8 = vunpack.c.h.bf16 %v67_v6  ;;  %485 = vmatprep.mubr.bf16.mxu1 %v67_v6 }
  0x23   :  { %452 = vmatpush3.bf16.msra.mxu0 %v659_v1  ;;  %472 = vmatpush3.bf16.msra.mxu1 %v659_v1  ;;  %v71_v18 = vunpack.c.l.bf16 %v68_v16  ;;  %v72_v19 = vunpack.c.h.bf16 %v68_v16 }
  0x24   :  { %453 = vmatprep.subr.bf16.mxu0 %v538_v2  ;;  %473 = vmatprep.subr.bf16.mxu1 %v538_v2  ;;  %v73_v10 = vsub.f32 %v665_v4, %v69_v7  ;;  %v74_v11 = vsub.f32 %v667_v5, %v70_v8 }
  0x25   :  { %v75_v21 = vsub.f32 %v673_v13, %v71_v18  ;;  %v76_v22 = vsub.f32 %v675_v14, %v72_v19 }
  0x26   :  { %v77_v12 = vpack.c.bf16 %v74_v11, %v73_v10 }
  0x27   :  { %454 = vmatpush3.bf16.msra.mxu0 %v538_v2  ;;  %474 = vmatpush3.bf16.msra.mxu1 %v538_v2  ;;  %v78_v23 = vpack.c.bf16 %v76_v22, %v75_v21 }
  0x28   :  { %455 = vmatprep.subr.bf16.mxu0 %v539_v3  ;;  %475 = vmatprep.subr.bf16.mxu1 %v539_v3 }
  0x29   :  { %465 = vmatprep.mubr.bf16.mxu0 %v77_v12  ;;  %v408_v12 = vld [vmem:[%s703_s2] ss:$0 sm:$0xff] }
  0x2b   :  { %456 = vmatpush3.bf16.msra.mxu0 %v539_v3  ;;  %476 = vmatpush3.bf16.msra.mxu1 %v539_v3 }
  0x2c   :  { %457 = vmatprep.subr.bf16.mxu0 %v540_v9  ;;  %477 = vmatprep.subr.bf16.mxu1 %v540_v9 }
  0x2f   :  { %458 = vmatpush3.bf16.msra.mxu0 %v540_v9  ;;  %478 = vmatpush3.bf16.msra.mxu1 %v540_v9 }
  0x30   :  { %459 = vmatprep.subr.bf16.mxu0 %v541_v15  ;;  %479 = vmatprep.subr.bf16.mxu1 %v541_v15 }
  0x33   :  { %460 = vmatpush3.bf16.msra.mxu0 %v541_v15  ;;  %480 = vmatpush3.bf16.msra.mxu1 %v541_v15 }
  0x34   :  { %461 = vmatprep.subr.bf16.mxu0 %v542_v17  ;;  %481 = vmatprep.subr.bf16.mxu1 %v542_v17 }
  0x37   :  { %462 = vmatpush3.bf16.msra.mxu0 %v542_v17  ;;  %482 = vmatpush3.bf16.msra.mxu1 %v542_v17 }
  0x38   :  { %463 = vmatprep.subr.bf16.mxu0 %v543_v20  ;;  %483 = vmatprep.subr.bf16.mxu1 %v543_v20 }
  0x3b   :  { %464 = vmatpush3.bf16.msra.mxu0 %v543_v20  ;;  %484 = vmatpush3.bf16.msra.mxu1 %v543_v20 }
  0x3c   :  { %509 = vmatprep.subr.bf16.mxu1 %v536_v0  ;;  %489 = vmatprep.subr.bf16.mxu0 %v536_v0 }
  0x3e   :  { %466 = vmatmul.mubr.bf16.vlgmr.msra.gmra.mxu0 %v78_v23  ;;  %486 = vmatmul.mubr.bf16.vlgmr.msra.gmra.mxu1 %v68_v16 }
  0x3f   :  { %510 = vmatpush3.bf16.msra.mxu1 %v536_v0  ;;  %490 = vmatpush3.bf16.msra.mxu0 %v536_v0 }
  0x40   :  { %511 = vmatprep.subr.bf16.mxu1 %v659_v1  ;;  %491 = vmatprep.subr.bf16.mxu0 %v659_v1 }
  0x43   :  { %512 = vmatpush3.bf16.msra.mxu1 %v659_v1  ;;  %492 = vmatpush3.bf16.msra.mxu0 %v659_v1 }
  0x44   :  { %513 = vmatprep.subr.bf16.mxu1 %v538_v2  ;;  %493 = vmatprep.subr.bf16.mxu0 %v538_v2 }
  0x47   :  { %514 = vmatpush3.bf16.msra.mxu1 %v538_v2  ;;  %494 = vmatpush3.bf16.msra.mxu0 %v538_v2 }
  0x48   :  { %515 = vmatprep.subr.bf16.mxu1 %v539_v3  ;;  %495 = vmatprep.subr.bf16.mxu0 %v539_v3 }
  0x4b   :  { %516 = vmatpush3.bf16.msra.mxu1 %v539_v3  ;;  %496 = vmatpush3.bf16.msra.mxu0 %v539_v3 }
  0x4c   :  { %517 = vmatprep.subr.bf16.mxu1 %v540_v9  ;;  %497 = vmatprep.subr.bf16.mxu0 %v540_v9 }
  0x4f   :  { %518 = vmatpush3.bf16.msra.mxu1 %v540_v9  ;;  %498 = vmatpush3.bf16.msra.mxu0 %v540_v9  ;;  %v407_v9 = vld [vmem:[%s702_s1] ss:$0 sm:$0xff]  ;;  %s592_s1 = scalar_lea.vmem %s387_s6, 512 }
  0x50   :  { %519 = vmatprep.subr.bf16.mxu1 %v541_v15  ;;  %499 = vmatprep.subr.bf16.mxu0 %v541_v15  ;;  %p593_p10 = scmp.ne.s32.totalorder %s387_s6, %s592_s1  ;;  %p598_p12 = scmp.lt.s32.totalorder %s592_s1, %s592_s1 }
  0x52   :  { %p599_p13 = por %p598_p12, %p597_p11 }
  0x53   :  { %520 = vmatpush3.bf16.msra.mxu1 %v541_v15  ;;  %500 = vmatpush3.bf16.msra.mxu0 %v541_v15 }
  0x54   :  { %521 = vmatprep.subr.bf16.mxu1 %v542_v17  ;;  %501 = vmatprep.subr.bf16.mxu0 %v542_v17  ;;  %p600_p0 = pnand %p599_p13, %p593_p10 }
  0x57   :  { %522 = vmatpush3.bf16.msra.mxu1 %v542_v17  ;;  %502 = vmatpush3.bf16.msra.mxu0 %v542_v17 }
  0x58   :  { %523 = vmatprep.subr.bf16.mxu1 %v543_v20  ;;  %503 = vmatprep.subr.bf16.mxu0 %v543_v20 }
  0x5b   :  { %524 = vmatpush3.bf16.msra.mxu1 %v543_v20  ;;  %504 = vmatpush3.bf16.msra.mxu0 %v543_v20 }
  0xfe   :  { %v467_v24 = vpop.f32.mrf.mxu0  ;;  %v487_v25 = vpop.f32.mrf.mxu1 }
  0xff   :  { %v219_v26 = vadd.f32 %v487_v25, %v467_v24 }
 0x100   :  { %v161_v27 = vpop.f32.mrf.mxu0  ;;  %v210_v28 = vpop.f32.mrf.mxu1 }
 0x101   :  { %v211_v29 = vadd.f32 %v210_v28, %v161_v27  ;;  %v227_v32 = vsub.f32 %v673_v13, %v219_v26 }
 0x102   :  { %v468_v30 = vpop.f32.mrf.mxu0  ;;  %v488_v31 = vpop.f32.mrf.mxu1 }
 0x103   :  { %v222_v33 = vadd.f32 %v488_v31, %v468_v30  ;;  %v225_v36 = vsub.f32 %v665_v4, %v211_v29  ;;  %v231_v39 = vmul.f32 %v227_v32, %v227_v32 }
 0x104   :  { %v164_v34 = vpop.f32.mrf.mxu0  ;;  %v213_v35 = vpop.f32.mrf.mxu1 }
 0x105   :  { %v228_v37 = vsub.f32 %v675_v14, %v222_v33  ;;  %v214_v38 = vadd.f32 %v213_v35, %v164_v34  ;;  %v229_v42 = vmul.f32 %v225_v36, %v225_v36 }
 0x107   :  { %v232_v40 = vmul.f32 %v228_v37, %v228_v37  ;;  %v226_v41 = vsub.f32 %v667_v5, %v214_v38 }
 0x109   :  { %v234_v43 = vpack.c.bf16 %v232_v40, %v231_v39  ;;  %v230_v44 = vmul.f32 %v226_v41, %v226_v41 }
 0x10b   :  { %v237_v45 = vunpack.c.l.bf16 %v234_v43  ;;  %v238_v46 = vunpack.c.h.bf16 %v234_v43  ;;  %v233_v47 = vpack.c.bf16 %v230_v44, %v229_v42 }
 0x10d   :  { %525 = vmatprep.mubr.bf16.mxu1 %v233_v47  ;;  %v235_v48 = vunpack.c.l.bf16 %v233_v47  ;;  %v236_v49 = vunpack.c.h.bf16 %v233_v47  ;;  %v242_v50 = vsub.f32 %v232_v40, %v238_v46  ;;  %v241_v51 = vsub.f32 %v231_v39, %v237_v45 }
 0x10e   :  { %526 = vmatmul.mubr.bf16.vlgmr.msra.gmra.mxu1 %v234_v43 }
 0x10f   :  { %v239_v52 = vsub.f32 %v229_v42, %v235_v48  ;;  %v240_v53 = vsub.f32 %v230_v44, %v236_v49  ;;  %v244_v55 = vpack.c.bf16 %v242_v50, %v241_v51 }
 0x111   :  { %v243_v54 = vpack.c.bf16 %v240_v53, %v239_v52 }
 0x113   :  { %505 = vmatprep.mubr.bf16.mxu0 %v243_v54 }
 0x114   :  { %506 = vmatmul.mubr.bf16.vlgmr.msra.gmra.mxu0 %v244_v55 }
 0x1ce   :  { %v527_v56 = vpop.f32.mrf.mxu1 }
 0x1d0   :  { %v328_v57 = vpop.f32.mrf.mxu1 }
 0x1d2   :  { %v528_v60 = vpop.f32.mrf.mxu1 }
 0x1d4   :  { %v507_v58 = vpop.f32.mrf.mxu0  ;;  %v331_v3 = vpop.f32.mrf.mxu1 }
 0x1d5   :  { %v337_v59 = vadd.f32 %v527_v56, %v507_v58 }
 0x1d6   :  { %v279_v61 = vpop.f32.mrf.mxu0 }
 0x1d7   :  { %v345_v62 = vadd.f32 1e-06, %v337_v59  ;;  %v329_v63 = vadd.f32 %v328_v57, %v279_v61 }
 0x1d8   :  { %v508_v0 = vpop.f32.mrf.mxu0 }
 0x1d9   :  { %544 = vrsqrt.f32 %v345_v62  ;;  %v343_v1 = vadd.f32 1e-06, %v329_v63  ;;  %v340_v2 = vadd.f32 %v528_v60, %v508_v0 }
 0x1da   :  { %v282_v4 = vpop.f32.mrf.mxu0 }
 0x1db   :  { %546 = vrsqrt.f32 %v343_v1  ;;  %v346_v5 = vadd.f32 1e-06, %v340_v2  ;;  %v332_v6 = vadd.f32 %v331_v3, %v282_v4 }
 0x1dd   :  { %548 = vrsqrt.f32 %v346_v5  ;;  %v344_v7 = vadd.f32 1e-06, %v332_v6 }
 0x1df   :  { %550 = vrsqrt.f32 %v344_v7 }
 0x1e6   :  { %v545_v8 = vpop.eup %544 }
 0x1e7   :  { %v355_v10 = vmul.f32 %v545_v8, %v227_v32 }
 0x1e8   :  { %v547_v11 = vpop.eup %546 }
 0x1e9   :  { %v353_v13 = vmul.f32 %v547_v11, %v225_v36  ;;  %v365_v14 = vmul.f32 %v407_v9, %v355_v10 }
 0x1ea   :  { %v549_v15 = vpop.eup %548 }
 0x1eb   :  { %v356_v16 = vmul.f32 %v549_v15, %v228_v37  ;;  %v363_v17 = vmul.f32 %v407_v9, %v353_v13  ;;  %v375_v18 = vadd.f32 %v408_v12, %v365_v14 }
 0x1ec   :  { %v551_v19 = vpop.eup %550 }
 0x1ed   :  { %v354_v20 = vmul.f32 %v551_v19, %v226_v41  ;;  %v366_v21 = vmul.f32 %v407_v9, %v356_v16  ;;  %v373_v22 = vadd.f32 %v408_v12, %v363_v17  ;;  %379 = vst [vmem:[#allocation7 + $0x10] sm:$0xff] %v375_v18 }
 0x1ef   :  { %v364_v23 = vmul.f32 %v407_v9, %v354_v20  ;;  %v376_v24 = vadd.f32 %v408_v12, %v366_v21  ;;  %377 = vst [vmem:[#allocation7] sm:$0xff] %v373_v22 }
 0x1f1   :  { %v374_v25 = vadd.f32 %v408_v12, %v364_v23  ;;  %380 = vst [vmem:[#allocation7 + $0x18] sm:$0xff] %v376_v24 }
 0x1f3   :  { %378 = vst [vmem:[#allocation7 + $0x8] sm:$0xff] %v374_v25 }
 0x1f4   :  { %603 = shalt.err (!%p600_p0)
}
 0x1f5   :  { %392 = dma.vmem_to_hbm [thread:$0]  %s387_s6, 512, %s705_s4, [#allocation4], %s619_s18, %s619_s18, %s620_s19  }
 0x1f6   :  { %616 = dma.done.wait [#allocation4], 512  }
 0x1f7   :  { %617 = vsyncadd [#allocation4], 4294966784 }
 0x1f8   :  { %396 = vsyncpa [#allocation3], 1 }
 0x1f9   :  { %397 = vsyncpa [#allocation6], 1 }
 0x1fa   :  { %398 = vsyncpa [#allocation4], 1 }

</bundles_post_ra>
